<compile_context>
chip_gen: v5e
topology: v5e:2x2
jax: 0.10.0
libtpu: 0.0.40
codegen_flags: <defaults>
</compile_context>

<pallas_src>
import functools

import jax
import jax.numpy as jnp
from jax.experimental import pallas as pl
from jax.experimental.pallas import tpu as pltpu


def _round_up(a, m):
    return (a + m - 1) // m * m


def _sublane_pack(dtype):
    # Sublane packing multiple for the compute dtype: f32 -> 8, bf16 -> 16, 8-bit -> 32.
    return 8 * (4 // jnp.dtype(dtype).itemsize)


def _dilated_conv1d_kernel(x_main_ref, x_halo_ref, wf_ref, bf_ref, o_ref, slab_ref, *,
                           kernel_size, dilation, c_in_p, c_out_p, tile_l, neg_slope):
    # x_main_ref : (1, C_in_p, TILE_L)          input window aligned with this tile
    # x_halo_ref : (1, 1, C_in_p, HALO_BLK)     pre-gathered right halo for this tile
    # wf_ref     : (2*C_out_p, K*C_in_p)        fused weight (conv rows | skip rows)
    # bf_ref     : (2*C_out_p, 1)               fused f32 bias (conv | skip)
    # o_ref      : (1, C_out_p, TILE_L)
    # slab_ref   : (K*C_in_p, TILE_L)           VMEM scratch holding the K staged taps
    #
    # Stage the K dilated taps straight from the (already pipelined) refs into the
    # slab: slab[k*C_in_p + c, t] = x[c, t + k*dilation].  `off` is a Python constant,
    # so every slice below is a static ref slice; row offsets k*C_in_p are
    # sublane-aligned by construction.  The lane offsets are generally not multiples
    # of 128 — if these lower to VMEM copies rather than XLU rotates, switch to
    # pltpu.roll-based staging (XLU is otherwise idle here).
    for k in range(kernel_size):
        off = k * dilation
        r0, r1 = k * c_in_p, (k + 1) * c_in_p
        if off == 0:
            slab_ref[r0:r1, :] = x_main_ref[0]
        elif off < tile_l:
            slab_ref[r0:r1, :tile_l - off] = x_main_ref[0, :, off:]
            slab_ref[r0:r1, tile_l - off:] = x_halo_ref[0, 0, :, :off]
        else:
            # Whole tap lives in the halo block (halo >= tile_l: very large dilation).
            slab_ref[r0:r1, :] = x_halo_ref[0, 0, :, off - tile_l:off]

    # Dilated conv + 1x1 skip in ONE MXU matmul (skip weight = extra output rows;
    # free while 2*C_out_p <= MXU height: 128 on v5e, 256 on v6e/v7x).  f32 accumulate.
    fused = jnp.dot(wf_ref[...], slab_ref[...],
                    preferred_element_type=jnp.float32) + bf_ref[...]
    conv = fused[:c_out_p]                               # dilated-conv branch
    x1 = jnp.where(conv >= 0, conv, neg_slope * conv)    # LeakyReLU(0.1), f32 epilogue
    x2 = fused[c_out_p:]                                 # skip branch (already cropped)
    o_ref[0] = (x1 + x2).astype(o_ref.dtype)


def dilated_conv1d(x, w, b, ws, bs, *, dilation, neg_slope=0.1,
                   tile_l=1024, compute_dtype=None):
    """x: (B, C_in, L); w: (C_out, C_in, K); b: (C_out,); ws: (C_out, C_in); bs: (C_out,).

    compute_dtype: dtype fed to the MXU (jnp.bfloat16 recommended on v5e/v6e/v7x).
    Accumulation, bias add and LeakyReLU stay f32.
    tile_l: length-tile size; 1024-2048 suits v5e/v6e (128 MiB VMEM), 512-1024 v7x
    (64 MiB per TC). vmem_limit_bytes is derived from it automatically below.
    """
    B, C_in, L = x.shape
    C_out, _, K = w.shape
    halo = dilation * (K - 1)
    L_out = L - halo
    assert L_out > 0, "sequence too short for this kernel_size/dilation"

    if compute_dtype is None:
        compute_dtype = x.dtype
    compute_dtype = jnp.dtype(compute_dtype)

    # Channel padding to sublane-pack multiples -> aligned slab writes & full stores.
    c_in_p = _round_up(C_in, _sublane_pack(compute_dtype))
    c_out_p = _round_up(C_out, 8)

    # Lane-dense tiling along length. tile_l is a free knob (NOT coupled to halo_blk).
    halo_blk = _round_up(max(halo, 1), 128)
    tl = min(_round_up(max(tile_l, 128), 128), _round_up(L_out, 128))
    num_tiles = -(-L_out // tl)
    l_out_pad = num_tiles * tl
    l_in_pad = _round_up(l_out_pad + halo_blk, tl)   # divisible by tl, covers all halos

    x_pad = jnp.pad(x.astype(compute_dtype),
                    ((0, 0), (0, c_in_p - C_in), (0, l_in_pad - L)))

    # Pre-gather the per-tile right halo: halo for tile t = x_pad[:, :, (t+1)*tl : +halo_blk].
    # Plain Blocked indexing in the kernel; cost ~ (halo_blk/tl) of the input, done once.
    halo_idx = (jnp.arange(1, num_tiles + 1)[:, None] * tl
                + jnp.arange(halo_blk)[None, :])                     # (num_tiles, halo_blk)
    x_halo = jnp.transpose(jnp.take(x_pad, halo_idx, axis=2), (0, 2, 1, 3))
    # -> (B, num_tiles, c_in_p, halo_blk)

    # Fused weight: rows [0, C_out) = folded dilated-conv taps (tap-major columns, each
    # tap zero-padded C_in -> c_in_p); rows [c_out_p, c_out_p+C_out) = 1x1 skip weight,
    # nonzero only in the last-tap column block (the last tap IS the cropped slice).
    w_taps = jnp.pad(jnp.transpose(w, (0, 2, 1)),                    # (C_out, K, C_in)
                     ((0, 0), (0, 0), (0, c_in_p - C_in)))
    w_fused = jnp.zeros((2 * c_out_p, K * c_in_p), jnp.float32)
    w_fused = w_fused.at[:C_out, :].set(w_taps.reshape(C_out, K * c_in_p))
    w_fused = w_fused.at[c_out_p:c_out_p + C_out,
                         (K - 1) * c_in_p:(K - 1) * c_in_p + C_in].set(ws)
    w_fused = w_fused.astype(compute_dtype)

    b_fused = jnp.zeros((2 * c_out_p, 1), jnp.float32)
    b_fused = b_fused.at[:C_out, 0].set(b)
    b_fused = b_fused.at[c_out_p:c_out_p + C_out, 0].set(bs)

    # Explicit scoped-VMEM budget for the chosen tile size / dtypes.
    itm = compute_dtype.itemsize
    out_itm = jnp.dtype(x.dtype).itemsize
    need = (2 * c_in_p * tl * itm                     # main input block, double-buffered
            + 2 * c_in_p * halo_blk * itm             # halo block, double-buffered
            + 2 * (2 * c_out_p) * (K * c_in_p) * itm  # resident fused weight
            + 2 * (2 * c_out_p) * 4                   # resident fused bias
            + 2 * c_out_p * tl * out_itm              # output block, double-buffered
            + K * c_in_p * tl * itm                   # slab scratch
            + 3 * (2 * c_out_p) * tl * 4)             # fused result + epilogue temps (f32)
    vmem_limit = int(min(max(2 * need, 32 * 1024 * 1024), 128 * 1024 * 1024))

    kern = functools.partial(_dilated_conv1d_kernel,
                             kernel_size=K, dilation=dilation,
                             c_in_p=c_in_p, c_out_p=c_out_p, tile_l=tl,
                             neg_slope=neg_slope)

    out = pl.pallas_call(
        kern,
        out_shape=jax.ShapeDtypeStruct((B, c_out_p, l_out_pad), x.dtype),
        grid_spec=pltpu.PrefetchScalarGridSpec(
            num_scalar_prefetch=0,
            grid=(B, num_tiles),
            in_specs=[
                # Main input window for this output tile (lane-aligned, pipelined).
                pl.BlockSpec((1, c_in_p, tl), lambda bb, t: (bb, 0, t)),
                # Pre-gathered right halo for this tile (plain Blocked index).
                pl.BlockSpec((1, 1, c_in_p, halo_blk), lambda bb, t: (bb, t, 0, 0)),
                # Grid-invariant fused weight / bias (stay resident in VMEM).
                pl.BlockSpec((2 * c_out_p, K * c_in_p), lambda bb, t: (0, 0)),
                pl.BlockSpec((2 * c_out_p, 1), lambda bb, t: (0, 0)),
            ],
            out_specs=pl.BlockSpec((1, c_out_p, tl), lambda bb, t: (bb, 0, t)),
            scratch_shapes=[pltpu.VMEM((K * c_in_p, tl), compute_dtype)],
        ),
        compiler_params=pltpu.CompilerParams(
            dimension_semantics=("parallel", "parallel"),
            vmem_limit_bytes=vmem_limit),
    )(x_pad, x_halo, w_fused, b_fused)

    return out[:, :C_out, :L_out]                 # crop channel/lane padding


def _reference(x, w, b, ws, bs, dilation):
    """Plain-JAX reference matching the PyTorch forward semantics."""
    C_out, C_in, K = w.shape
    L = x.shape[-1]
    L_out = L - dilation * (K - 1)
    acc = jnp.zeros((x.shape[0], C_out, L_out), jnp.float32)
    for k in range(K):
        off = k * dilation
        acc = acc + jnp.einsum('oc,bcl->bol', w[:, :, k], x[:, :, off:off + L_out])
    x1 = acc + b[None, :, None]
    x1 = jnp.where(x1 >= 0, x1, 0.1 * x1)
    crop = dilation * (K - 1)
    x2 = jnp.einsum('oc,bcl->bol', ws, x[:, :, crop:]) + bs[None, :, None]
    return x1 + x2


def _make_params(key, c_in, c_out, k):
    kw, kws = jax.random.split(key)
    # kaiming_normal_ (fan_in) for conv weights, zero biases (as in the module).
    std_w = (2.0 / (c_in * k)) ** 0.5
    w = std_w * jax.random.normal(kw, (c_out, c_in, k), dtype=jnp.float32)
    b = jnp.zeros((c_out,), jnp.float32)
    std_ws = (2.0 / c_in) ** 0.5
    ws = std_ws * jax.random.normal(kws, (c_out, c_in), dtype=jnp.float32)
    bs = jnp.zeros((c_out,), jnp.float32)
    return w, b, ws, bs


if __name__ == "__main__":
    key = jax.random.PRNGKey(0)
    kx1, kp1, kx2, kp2, kx3, kp3 = jax.random.split(key, 6)

    # --- small single-tile case, f32 compute ---
    B, C_in, C_out, K, dilation, L = 2, 8, 8, 3, 2, 16
    x = jax.random.normal(kx1, (B, C_in, L), dtype=jnp.float32)
    w, b, ws, bs = _make_params(kp1, C_in, C_out, K)

    out = jax.block_until_ready(dilated_conv1d(x, w, b, ws, bs, dilation=dilation))
    ref = _reference(x, w, b, ws, bs, dilation)
    assert out.shape == (B, C_out, L - dilation * (K - 1))
    assert jnp.allclose(out, ref, atol=1e-5, rtol=1e-5)

    # --- bf16 MXU operands (all generations), f32 epilogue; looser tolerance ---
    out_bf16 = jax.block_until_ready(
        dilated_conv1d(x, w, b, ws, bs, dilation=dilation,
                       compute_dtype=jnp.bfloat16))
    assert out_bf16.shape == ref.shape
    assert jnp.allclose(out_bf16, ref, atol=1e-1, rtol=1e-1)

    # --- multi-tile case: exercises L-tiling + halo pieces + output cropping ---
    B2, C_in2, C_out2, K2, d2, L2 = 2, 16, 8, 3, 4, 300
    x2 = jax.random.normal(kx2, (B2, C_in2, L2), dtype=jnp.float32)
    w2, b2_, ws2, bs2_ = _make_params(kp2, C_in2, C_out2, K2)
    out2 = jax.block_until_ready(
        dilated_conv1d(x2, w2, b2_, ws2, bs2_, dilation=d2, tile_l=128))
    ref2 = _reference(x2, w2, b2_, ws2, bs2_, d2)
    assert out2.shape == ref2.shape == (B2, C_out2, L2 - d2 * (K2 - 1))
    assert jnp.allclose(out2, ref2, atol=1e-4, rtol=1e-4)

    # --- large-dilation case (halo >= tile): exercises the decoupled halo path ---
    B3, C_in3, C_out3, K3, d3, L3 = 2, 8, 8, 2, 150, 450
    x3 = jax.random.normal(kx3, (B3, C_in3, L3), dtype=jnp.float32)
    w3, b3_, ws3, bs3_ = _make_params(kp3, C_in3, C_out3, K3)
    out3 = jax.block_until_ready(
        dilated_conv1d(x3, w3, b3_, ws3, bs3_, dilation=d3, tile_l=128))
    ref3 = _reference(x3, w3, b3_, ws3, bs3_, d3)
    assert out3.shape == ref3.shape == (B3, C_out3, L3 - d3 * (K3 - 1))
    assert jnp.allclose(out3, ref3, atol=1e-4, rtol=1e-4)

    print("KERNEL_OK")
</pallas_src>

<mosaic_0001>
module attributes {stable_mosaic.version = 11 : i64} {
  func.func @_dilated_conv1d_kernel(%arg0: i32, %arg1: i32, %arg2: memref<1x8x128xf32, #tpu.memory_space<vmem>>, %arg3: memref<1x1x8x128xf32, #tpu.memory_space<vmem>>, %arg4: memref<16x24xf32, #tpu.memory_space<vmem>>, %arg5: memref<16x1xf32, #tpu.memory_space<vmem>>, %arg6: memref<1x8x128xf32, #tpu.memory_space<vmem>>, %arg7: memref<24x128xf32, #tpu.memory_space<vmem>>) attributes {dimension_semantics = [#tpu.dimension_semantics<parallel>, #tpu.dimension_semantics<parallel>], iteration_bounds = array<i64: 2, 1>, scalar_prefetch = 0 : i64, scratch_operands = 1 : i64, tpu.core_type = #tpu.core_type<tc>, window_params = [{transform_indices = @transform_0, window_bounds = array<i64: 1, 8, 128>}, {transform_indices = @transform_1, window_bounds = array<i64: 1, 1, 8, 128>}, {pipeline_mode = #tpu.pipeline_mode<synchronous>, transform_indices = @transform_2, window_bounds = array<i64: 16, 24>}, {pipeline_mode = #tpu.pipeline_mode<synchronous>, transform_indices = @transform_3, window_bounds = array<i64: 16, 1>}, {transform_indices = @transform_4, window_bounds = array<i64: 1, 8, 128>}]} {
    %c0 = arith.constant 0 : index
    %c0_0 = arith.constant 0 : index
    %c0_1 = arith.constant 0 : index
    %0 = vector.load %arg2[%c0, %c0_0, %c0_1] : memref<1x8x128xf32, #tpu.memory_space<vmem>>, vector<1x8x128xf32>
    %1 = vector.shape_cast %0 : vector<1x8x128xf32> to vector<8x128xf32>
    %c0_2 = arith.constant 0 : index
    %c0_3 = arith.constant 0 : index
    %2 = vector.load %arg7[%c0_2, %c0_3] : memref<24x128xf32, #tpu.memory_space<vmem>>, vector<8x128xf32>
    tpu.vector_store %arg7[%c0_2, %c0_3], %1 {strides = array<i32>} : memref<24x128xf32, #tpu.memory_space<vmem>>, vector<8x128xf32>,
    %c0_4 = arith.constant 0 : index
    %c0_5 = arith.constant 0 : index
    %c2 = arith.constant 2 : index
    %3 = vector.load %arg2[%c0_4, %c0_5, %c2] : memref<1x8x128xf32, #tpu.memory_space<vmem>>, vector<1x8x126xf32>
    %4 = vector.shape_cast %3 : vector<1x8x126xf32> to vector<8x126xf32>
    %c8 = arith.constant 8 : index
    %c0_6 = arith.constant 0 : index
    %5 = vector.load %arg7[%c8, %c0_6] : memref<24x128xf32, #tpu.memory_space<vmem>>, vector<8x126xf32>
    tpu.vector_store %arg7[%c8, %c0_6], %4 {strides = array<i32>} : memref<24x128xf32, #tpu.memory_space<vmem>>, vector<8x126xf32>,
    %c0_7 = arith.constant 0 : index
    %c0_8 = arith.constant 0 : index
    %c0_9 = arith.constant 0 : index
    %c0_10 = arith.constant 0 : index
    %6 = vector.load %arg3[%c0_7, %c0_8, %c0_9, %c0_10] : memref<1x1x8x128xf32, #tpu.memory_space<vmem>>, vector<1x1x8x2xf32>
    %7 = vector.shape_cast %6 : vector<1x1x8x2xf32> to vector<8x2xf32>
    %c8_11 = arith.constant 8 : index
    %c126 = arith.constant 126 : index
    %8 = vector.load %arg7[%c8_11, %c126] : memref<24x128xf32, #tpu.memory_space<vmem>>, vector<8x2xf32>
    tpu.vector_store %arg7[%c8_11, %c126], %7 {strides = array<i32>} : memref<24x128xf32, #tpu.memory_space<vmem>>, vector<8x2xf32>,
    %c0_12 = arith.constant 0 : index
    %c0_13 = arith.constant 0 : index
    %c4 = arith.constant 4 : index
    %9 = vector.load %arg2[%c0_12, %c0_13, %c4] : memref<1x8x128xf32, #tpu.memory_space<vmem>>, vector<1x8x124xf32>
    %10 = vector.shape_cast %9 : vector<1x8x124xf32> to vector<8x124xf32>
    %c16 = arith.constant 16 : index
    %c0_14 = arith.constant 0 : index
    %11 = vector.load %arg7[%c16, %c0_14] : memref<24x128xf32, #tpu.memory_space<vmem>>, vector<8x124xf32>
    tpu.vector_store %arg7[%c16, %c0_14], %10 {strides = array<i32>} : memref<24x128xf32, #tpu.memory_space<vmem>>, vector<8x124xf32>,
    %c0_15 = arith.constant 0 : index
    %c0_16 = arith.constant 0 : index
    %c0_17 = arith.constant 0 : index
    %c0_18 = arith.constant 0 : index
    %12 = vector.load %arg3[%c0_15, %c0_16, %c0_17, %c0_18] : memref<1x1x8x128xf32, #tpu.memory_space<vmem>>, vector<1x1x8x4xf32>
    %13 = vector.shape_cast %12 : vector<1x1x8x4xf32> to vector<8x4xf32>
    %c16_19 = arith.constant 16 : index
    %c124 = arith.constant 124 : index
    %14 = vector.load %arg7[%c16_19, %c124] : memref<24x128xf32, #tpu.memory_space<vmem>>, vector<8x4xf32>
    tpu.vector_store %arg7[%c16_19, %c124], %13 {strides = array<i32>} : memref<24x128xf32, #tpu.memory_space<vmem>>, vector<8x4xf32>,
    %c0_20 = arith.constant 0 : index
    %c0_21 = arith.constant 0 : index
    %15 = vector.load %arg4[%c0_20, %c0_21] : memref<16x24xf32, #tpu.memory_space<vmem>>, vector<16x24xf32>
    %c0_22 = arith.constant 0 : index
    %c0_23 = arith.constant 0 : index
    %16 = vector.load %arg7[%c0_22, %c0_23] : memref<24x128xf32, #tpu.memory_space<vmem>>, vector<24x128xf32>
    %cst = arith.constant dense<0.000000e+00> : vector<16x128xf32>
    %17 = tpu.matmul %15, %16, %cst {dimension_numbers = #tpu.dot_dimension_numbers<[1], [0], [0], [1], [0, 0, 1, 1], [], []>} : vector<16x24xf32>, vector<24x128xf32>, vector<16x128xf32> -> vector<16x128xf32>
    %c0_24 = arith.constant 0 : index
    %c0_25 = arith.constant 0 : index
    %18 = vector.load %arg5[%c0_24, %c0_25] : memref<16x1xf32, #tpu.memory_space<vmem>>, vector<16x1xf32>
    %19 = vector.broadcast %18 : vector<16x1xf32> to vector<16x128xf32>
    %20 = arith.addf %17, %19 : vector<16x128xf32>
    %21 = vector.extract_strided_slice %20 {offsets = [0, 0], sizes = [8, 128], strides = [1, 1]} : vector<16x128xf32> to vector<8x128xf32>
    %cst_26 = arith.constant 0.000000e+00 : f32
    %22 = vector.broadcast %cst_26 : f32 to vector<8x128xf32>
    %23 = arith.cmpf oge, %21, %22 : vector<8x128xf32>
    %cst_27 = arith.constant 1.000000e-01 : f32
    %24 = vector.broadcast %cst_27 : f32 to vector<8x128xf32>
    %25 = arith.mulf %24, %21 : vector<8x128xf32>
    %26 = arith.select %23, %21, %25 : vector<8x128xi1>, vector<8x128xf32>
    %27 = vector.extract_strided_slice %20 {offsets = [8, 0], sizes = [8, 128], strides = [1, 1]} : vector<16x128xf32> to vector<8x128xf32>
    %28 = arith.addf %26, %27 : vector<8x128xf32>
    %c0_28 = arith.constant 0 : index
    %c0_29 = arith.constant 0 : index
    %c0_30 = arith.constant 0 : index
    %29 = vector.load %arg6[%c0_28, %c0_29, %c0_30] : memref<1x8x128xf32, #tpu.memory_space<vmem>>, vector<1x8x128xf32>
    %30 = vector.shape_cast %29 : vector<1x8x128xf32> to vector<8x128xf32>
    %31 = vector.shape_cast %28 : vector<8x128xf32> to vector<1x8x128xf32>
    tpu.vector_store %arg6[%c0_28, %c0_29, %c0_30], %31 {strides = array<i32>} : memref<1x8x128xf32, #tpu.memory_space<vmem>>, vector<1x8x128xf32>,
    return
  }
  func.func @transform_0(%arg0: i32, %arg1: i32) -> (i32, i32, i32) {
    %c0_i32 = arith.constant 0 : i32
    %c0_i32_0 = arith.constant 0 : i32
    return %arg0, %c0_i32, %arg1 : i32, i32, i32
  }
  func.func @transform_1(%arg0: i32, %arg1: i32) -> (i32, i32, i32, i32) {
    %c0_i32 = arith.constant 0 : i32
    %c0_i32_0 = arith.constant 0 : i32
    %c0_i32_1 = arith.constant 0 : i32
    return %arg0, %arg1, %c0_i32, %c0_i32_0 : i32, i32, i32, i32
  }
  func.func @transform_2(%arg0: i32, %arg1: i32) -> (i32, i32) {
    %c0_i32 = arith.constant 0 : i32
    %c0_i32_0 = arith.constant 0 : i32
    %c0_i32_1 = arith.constant 0 : i32
    return %c0_i32, %c0_i32_0 : i32, i32
  }
  func.func @transform_3(%arg0: i32, %arg1: i32) -> (i32, i32) {
    %c0_i32 = arith.constant 0 : i32
    %c0_i32_0 = arith.constant 0 : i32
    %c0_i32_1 = arith.constant 0 : i32
    return %c0_i32, %c0_i32_0 : i32, i32
  }
  func.func @transform_4(%arg0: i32, %arg1: i32) -> (i32, i32, i32) {
    %c0_i32 = arith.constant 0 : i32
    %c0_i32_0 = arith.constant 0 : i32
    return %arg0, %c0_i32, %arg1 : i32, i32, i32
  }
}

</mosaic_0001>

<bundles_post_ra>
// kernel: tpu_custom_call.1
= control target key start
LH: loop header
LB: loop body
LE: loop exit
PB: predicated region body
PF: predicated region fallthrough
CT: control target
= control target key end

     0   :  { %9 = vsyncpa [#allocation4], 0  ;;  %s923_s0 = inlined_call_operand.hbm [shape: f32[2,8,256], index: 0, kind: input, shape index: {}]   ;;  %s924_s1 = inlined_call_operand.vmem [shape: f32[2,1,8,128], index: 1, kind: input, shape index: {}]   ;;  %s925_s2 = inlined_call_operand.hbm [shape: f32[16,24], index: 2, kind: input, shape index: {}]   ;;  %s926_s3 = inlined_call_operand.vmem [shape: f32[16,1], index: 3, kind: input, shape index: {}]   ;;  %s927_s4 = inlined_call_operand.hbm [shape: f32[2,8,128], index: 4, kind: output, shape index: {}]  }
   0x1   :  { %11 = vsyncpa [#allocation4 + $0x1], 0 }
   0x2   :  { %12 = vsyncpa [#allocation7], 0 }
   0x3   :  { %13 = vsyncpa [#allocation5], 0 }
   0x4   :  { %15 = vsyncpa [#allocation5 + $0x1], 0  ;;  %s765_s15 = smov 0   ;;  %s767_s16 = smov 0  }
   0x5   :  { %s769_s17 = smov 0   ;;  %s771_s18 = smov 0  }
   0x6   :  { %s773_s19 = smov 0   ;;  %s775_s20 = smov 0  }
   0x7 LB: > { %s483_s21 = sadd.s32 4294967295, %s732_s20   ;;  %p485_p0 = scmp.ge.s32.totalorder %s732_s20, 1  ;;  %s732_s20 = sphi %s775_s20, %s21_s20   ;;  %s728_s19 = sphi %s773_s19, %s938_s19   ;;  %s724_s18 = sphi %s771_s18, %s937_s18   ;;  %s720_s17 = sphi %s769_s17, %s936_s17   ;;  %s716_s16 = sphi %s767_s16, %s935_s16   ;;  %s712_s15 = sphi %s765_s15, %s934_s15  }
   0x8   : > { %p797_p1 = scmp.eq.s32.totalorder %s483_s21, 0  ;;  %p164_p2 = scmp.lt.s32.totalorder %s732_s20, 3 }
   0x9   : > { %s175_s25 = sshll.u32 %s925_s2, 4  ;;  %s734_s27 = smov [#allocation6]   ;;  %s176_s25 = int_to_ptr.hbm [resolvable:$true] %s175_s25 }
   0xa   : > { %p805_p3 = pnand %p485_p0, %p164_p2  ;;  %s177_s28 = sshll.u32 %s734_s27, 4  ;;  %s178_s28 = int_to_ptr.vmem [resolvable:$true] %s177_s28 }
   0xb   : > { %p487_p6 = scmp.ge.s32.totalorder %s732_s20, 2  ;;  %s735_s29 = smov 128  }
   0xc   : > { %p514_p4 = pneg %p805_p3  ;;  %s736_s30 = smov 8  }
   0xd   : > { %s484_s5 = sadd.s32 4294967294, %s732_s20   ;;  %s33_s6 = sadd.s32 1, %s728_s19 }
   0xe   : > { %p515_p5 = pnand %p514_p4, %p797_p1  ;;  %s42_s7 = sadd.s32 1, %s720_s17 }
   0xf   : > { %p35_p7 = scmp.ge.s32.totalorder %s33_s6, 2  ;;  %p49_p8 = scmp.ne.s32.totalorder %s720_s17, %s716_s16 }
  0x10   : > { %517 = dma.hbm_to_vmem [thread:$0]  (!%p515_p5), %s176_s25, 256, %s178_s28, [#allocation7], %s735_s29, %s735_s29, %s736_s30  }
  0x11   : > { %p50_p9 = scmp.eq.s32.totalorder %s732_s20, 0  ;;  %p55_p10 = scmp.ne.s32.totalorder %s716_s16, %s712_s15 }
  0x12   : > { %s940_s6 = smov (%p35_p7, %s33_s6), 0  ;;  %p151_p13 = scmp.eq.s32.totalorder %s483_s21, 1 }
  0x13   : > { %p824_p11 = por %p50_p9, %p49_p8  ;;  %p830_p12 = por %p797_p1, %p55_p10 }
  0x14   : > { %s37_s10 = ssub.s32 %s728_s19, %s940_s6  ;;  %p157_p2 = scmp.eq.s32.totalorder %s484_s5, 1 }
  0x15   : > { %p40_p0 = scmp.eq.s32.totalorder %s37_s10, 0  ;;  %p836_p4 = por %p151_p13, %p49_p8 }
  0x16   : > { %p527_p5 = scmp.lt.s32.totalorder %s732_s20, 2  ;;  %p844_p7 = por %p157_p2, %p55_p10 }
  0x17   : > { %s842_s12 = scalar_select %p40_p0, %s720_s17, %s42_s7  }
  0x18   : > { %s194_s14 = sand.u32 1, %s720_s17   ;;  %s502_s24 = sshll.u32 %s728_s19, 4 }
  0x19   : > { %s488_s23 = sshll.u32 %s194_s14, 3  ;;  %s204_s21 = scalar_lea.hbm %s923_s0, %s502_s24 }
  0x1a   : > { %s198_s28 = scalar_lea.vmem [#allocation3], %s488_s23  ;;  %s206_s30 = sshll.u32 %s204_s21, 4  ;;  %s207_s30 = int_to_ptr.hbm [resolvable:$true] %s206_s30 }
  0x1b   : > { %s208_s29 = sshll.u32 %s198_s28, 4  ;;  %p519_p8 = pnand %p527_p5, %p824_p11  ;;  %s209_s29 = int_to_ptr.vmem [resolvable:$true] %s208_s29 }
  0x1c   : > { %s195_s5 = scalar_lea.sflag [#allocation4], %s194_s14  ;;  %227 = sbr.rel (%p805_p3) target bundleno = 309 (0x135), region = 36 }
  0x1d   : > { %521 = dma.hbm_to_vmem [thread:$0]  (!%p519_p8), %s207_s30, 128, %s209_s29, %s195_s5  }
  0x1e   : > { %s858_s7 = sand.u32 (!%p805_p3), 1, %s716_s16  }
  0x1f   : > { %s492_s10 = sshll.u32 (!%p805_p3), %s858_s7, 3  ;;  %s230_s23 = scalar_lea.sflag (!%p805_p3), [#allocation4], %s858_s7 }
  0x20   : > { %s233_s24 = scalar_lea.vmem (!%p805_p3), [#allocation3], %s492_s10 }
  0x21   : > { %699 = dma.done.wait (%p830_p12), %s230_s23, 128  }
  0x22   : > { %701 = vsyncadd (%p830_p12), %s230_s23, 4294967168 }
  0x23   : > { %703 = dma.done.wait (%p797_p1), [#allocation7], 256  }
  0x24   : > { %705 = vsyncadd (%p797_p1), [#allocation7], 4294967040  ;;  %p271_p3 = scmp.lt.s32.totalorder %s724_s18, 1  ;;  %v294_v0 = vld [vmem:[%s233_s24] sm:$0xff]  ;;  %s737_s14 = smov 124   ;;  %v739_v3 = vmov 0  }
  0x25   : > { %296 = vrot.lane.b32.xlu0 %v294_v0, %s737_s14  ;;  %s738_s25 = smov 126   ;;  %v313_v2 = vld [vmem:[%s926_s3] sm:$0xff]  ;;  %584 = vset.pattern.permute.xlu2 %v739_v3  ;;  %v314_v4 = vld [vmem:[%s926_s3 + $0x8] sm:$0xff]  ;;  %vm299_vm0 = vcmask 1014784   ;;  %vm285_vm1 = vcmask 1031168   ;;  %vm306_vm2 = vcmask 1048544  }
  0x26   : > { %s272_s26 = scalar_select %p271_p3, %s724_s18, 1  ;;  %282 = vrot.lane.b32.xlu1 %v294_v0, %s738_s25  ;;  %585 = vset.pattern.permute.xlu0 %v739_v3  ;;  %vm292_vm3 = vcmask 1048560   ;;  %v308_v11 = vld [vmem:[#allocation6] sm:$0xff]  ;;  %vm325_vm4 = vcmask 195584   ;;  %v309_v12 = vld [vmem:[#allocation6 + $0x8] sm:$0xff] }
  0x27   : > { %317 = vperm.xlu2 %584, %v313_v2   ;;  %s499_s5 = sshll.u32 %s724_s18, 3  ;;  %s361_s18 = scalar_lea.sflag [#allocation5], %s858_s7 }
  0x28   : > { %s495_s8 = sshll.u32 %s272_s26, 3  ;;  %s372_s26 = scalar_lea.hbm %s927_s4, %s499_s5 }
  0x29   : > { %s277_s9 = scalar_lea.vmem %s924_s1, %s495_s8  ;;  %s270_s8 = scalar_lea.vmem [#allocation8], %s492_s10 }
  0x2a   : > { %v301_v1 = vld [vmem:[%s277_s9] sm:$0xff]  ;;  %s666_s10 = scalar_lea.hbm %s927_s4, 16 }
  0x2d   : > { %303 = vrot.lane.b32.xlu0 %v301_v1, %s737_s14  ;;  %s374_s14 = sshll.u32 %s270_s8, 4  ;;  %s375_s14 = int_to_ptr.vmem [resolvable:$true] %s374_s14 }
  0x2e   : > { %289 = vrot.lane.b32.xlu1 %v301_v1, %s738_s25  ;;  %s376_s25 = sshll.u32 %s372_s26, 4  ;;  %s377_s25 = int_to_ptr.hbm [resolvable:$true] %s376_s25 }
  0x2f   : > { %322 = vperm.xlu2 %584, %v314_v4   ;;  %s660_s27 = sshra.s32 %s377_s25, 4  ;;  %s661_s27 = int_to_ptr.hbm [resolvable:$true] %s660_s27 }
  0x30   : > { %s662_s21 = scalar_lea.hbm %s661_s27, 8  ;;  %p667_p11 = scmp.lt.s32.totalorder %s661_s27, %s927_s4 }
  0x31   : > { %p663_p1 = scmp.ne.s32.totalorder %s661_s27, %s662_s21  ;;  %p668_p12 = scmp.lt.s32.totalorder %s666_s10, %s662_s21 }
  0x33   : > { %p664_p9 = pnand %p663_p1, %p836_p4  ;;  %p669_p13 = por %p668_p12, %p667_p11 }
  0x35   : > { %p665_p10 = pneg %p664_p9 }
  0x37   : > { %p670_p0 = pnand %p669_p13, %p665_p10 }
  0x81   : > { %v318_v13 = vpop.permute.xlu2 %317 }
  0x89   : > { %v323_v17 = vpop.permute.xlu2 %322 }
  0x97   : > { %v297_v5 = vpop.permute.xlu0 %296 }
  0x98   : > { %v283_v6 = vpop.permute.xlu1 %282  ;;  %300 = vst.msk [vmem:[#allocation2 + $0x10] sm:$0xff] %vm299_vm0, %v297_v5 }
  0x99   : > { %286 = vst.msk [vmem:[#allocation2 + $0x8] sm:$0xff] %vm285_vm1, %v283_v6 }
  0x9f   : > { %v304_v7 = vpop.permute.xlu0 %303 }
  0xa0   : > { %v290_v8 = vpop.permute.xlu1 %289  ;;  %307 = vst.msk [vmem:[#allocation2 + $0x10] sm:$0xff] %vm306_vm2, %v304_v7 }
  0xa1   : > { %293 = vst.msk [vmem:[#allocation2 + $0x8] sm:$0xff] %vm292_vm3, %v290_v8 }
  0xa7   : > { %v312_v9 = vld [vmem:[#allocation2 + $0x10] sm:$0xff] }
  0xa8   : > { %345 = vmatpush.msra.mxu0 %v312_v9  ;;  %503 = vmatpush.msra.mxu1 %v312_v9  ;;  %v311_v10 = vld [vmem:[#allocation2 + $0x8] sm:$0xff] }
  0xaa   : > { %346 = vmatpush.msra.mxu0 %v311_v10  ;;  %504 = vmatpush.msra.mxu1 %v311_v10 }
  0xac   : > { %347 = vmatpush.msra.mxu0 %v294_v0  ;;  %505 = vmatpush.msra.mxu1 %v294_v0 }
  0xad   : > { %496 = vmatmul.msk.f32.vlgmr.msra.gmra.mxu0 %vm325_vm4, %v308_v11  ;;  %497 = vmatmul.msk.f32.vlgmr.msra.gmra.mxu1 %vm325_vm4, %v309_v12 }
 0x12a   : > { %v349_v14 = vpop.f32.mrf.mxu0  ;;  %v352_v16 = vpop.f32.mrf.mxu1 }
 0x12b   : > { %v350_v15 = vadd.f32 %v349_v14, %v318_v13  ;;  %v353_v19 = vadd.f32 %v352_v16, %v323_v17 }
 0x12d   : > { %vm355_vm5 = vcmp.ge.f32.partialorder %v350_v15, 0.0  ;;  %v356_v18 = vmul.f32 0.1, %v350_v15 }
 0x12f   : > { %v357_v20 = vsel %vm355_vm5, %v350_v15, %v356_v18 }
 0x130   : > { %v358_v21 = vadd.f32 %v357_v20, %v353_v19 }
 0x132   : > { %359 = vst [vmem:[%s270_s8] sm:$0xff] %v358_v21 }
 0x133   : > { %673 = shalt.err (!%p670_p0)
}
 0x134   : > { %512 = dma.vmem_to_hbm [thread:$0]  (%p836_p4), %s375_s14, 128, %s377_s25, %s361_s18  }
 0x135 PF: > { %s388_s7 = sand.u32 1, %s712_s15   ;;  %p523_p2 = pnand %p487_p6, %p844_p7 }
 0x136   : > { %s389_s30 = scalar_lea.sflag [#allocation5], %s388_s7 }
 0x137   : > { %p524_p5 = pneg %p523_p2 }
 0x139   : > { %707 = dma.done.wait (%p524_p5), %s389_s30, 128  }
 0x13a   : > { %709 = vsyncadd (%p524_p5), %s389_s30, 4294967168  ;;  %s21_s20 = sadd.s32 1, %s732_s20   ;;  %s934_s15 = smov %s716_s16 }
 0x13b   : > { %p18_p8 = scmp.ge.s32.totalorder %s21_s20, 4   ;;  %s935_s16 = smov %s720_s17 }
 0x13c   : > { %s936_s17 = smov %s842_s12  ;;  %s937_s18 = smov %s728_s19 }
 0x13d   : > { %s938_s19 = smov %s940_s6  ;;  %20 = sbr.rel (!%p18_p8) target bundleno = 7 (0x7), region = 88 }
 0x142   :  { %395 = vsyncpa [#allocation4], 1 }
 0x143   :  { %397 = vsyncpa [#allocation4 + $0x1], 1 }
 0x144   :  { %398 = vsyncpa [#allocation7], 1 }
 0x145   :  { %399 = vsyncpa [#allocation5], 1 }
 0x146   :  { %401 = vsyncpa [#allocation5 + $0x1], 1 }

</bundles_post_ra>
